<compile_context>
chip_gen: v7x
topology: tpu7x:2x2x1
jax: 0.10.0
libtpu: 0.0.40
codegen_flags: <defaults>
</compile_context>

<pallas_src>
import jax
import jax.numpy as jnp
from jax.experimental import pallas as pl
from jax.experimental.pallas import tpu as pltpu


def _round_up(x: int, m: int) -> int:
    return ((x + m - 1) // m) * m


def reward_mlp_kernel(s_ref, ns_ref, w1a_ref, w1b_ref, b1_ref, w2_ref, b2_ref, out_ref):
    # s_ref/ns_ref: [TM, state_size]
    # w1a_ref/w1b_ref: [state_size, hidden], b1_ref: [1, hidden]
    # w2_ref: [hidden, out_dim],             b2_ref: [1, out_dim]
    # out_ref: [TM, out_dim]
    h = (
        jnp.dot(s_ref[...], w1a_ref[...], preferred_element_type=jnp.float32)
        + jnp.dot(ns_ref[...], w1b_ref[...], preferred_element_type=jnp.float32)
        + b1_ref[...]
    )
    h = jnp.maximum(h, 0.0)  # ReLU on the VPU
    r = jnp.dot(h, w2_ref[...], preferred_element_type=jnp.float32) + b2_ref[...]
    out_ref[...] = r.astype(out_ref.dtype)


def reward_model_forward(
    state,
    next_state,
    params,
    *,
    block_rows: int = 4096,
    min_kernel_batch: int = 1024,
    force_kernel: bool = False,
):
    """Pallas forward pass of RewardModel.

    state, next_state: [B, state_size] float32
    params: dict with w1 [2*state_size, hidden], b1 [hidden],
                      w2 [hidden, out_dim],      b2 [out_dim]
    returns rewards: [B, out_dim] float32
    """
    b, state_size = state.shape
    hidden = params["w1"].shape[1]
    out_dim = params["w2"].shape[1]

    # Tiny-batch guard: a pallas_call launch costs a few microseconds of fixed
    # overhead; for a handful of rows the XLA fusion wins.
    if b < min_kernel_batch and not force_kernel:
        x = jnp.concatenate([state, next_state], axis=1)
        h = jnp.maximum(x @ params["w1"] + params["b1"], 0.0)
        return h @ params["w2"] + params["b2"]

    # Fuse the concat: split w1 into the halves that multiply state / next_state.
    w1a = params["w1"][:state_size]
    w1b = params["w1"][state_size:]
    b1 = params["b1"].reshape(1, hidden)
    b2 = params["b2"].reshape(1, out_dim)

    # Batch tile: multiple of 8 (f32 sublane), capped by block_rows.  Per-row
    # VMEM footprint is tiny (~hundreds of bytes), so large tiles are safe even
    # against v7x's 64 MiB VMEM with double-buffering.
    tm = min(block_rows, _round_up(b, 8))
    tm = _round_up(tm, 8)
    b_padded = _round_up(b, tm)
    if b_padded != b:
        pad = b_padded - b
        state = jnp.pad(state, ((0, pad), (0, 0)))
        next_state = jnp.pad(next_state, ((0, pad), (0, 0)))

    grid = (b_padded // tm,)

    out = pl.pallas_call(
        reward_mlp_kernel,
        out_shape=jax.ShapeDtypeStruct((b_padded, out_dim), jnp.float32),
        grid=grid,
        in_specs=[
            # Activations: streamed per batch tile (auto double-buffered).
            pl.BlockSpec((tm, state_size), lambda i: (i, 0)),
            pl.BlockSpec((tm, state_size), lambda i: (i, 0)),
            # Parameters: constant block index -> fetched once, VMEM-resident.
            pl.BlockSpec((state_size, hidden), lambda i: (0, 0)),
            pl.BlockSpec((state_size, hidden), lambda i: (0, 0)),
            pl.BlockSpec((1, hidden), lambda i: (0, 0)),
            pl.BlockSpec((hidden, out_dim), lambda i: (0, 0)),
            pl.BlockSpec((1, out_dim), lambda i: (0, 0)),
        ],
        out_specs=pl.BlockSpec((tm, out_dim), lambda i: (i, 0)),
        compiler_params=pltpu.CompilerParams(dimension_semantics=("parallel",)),
    )(state, next_state, w1a, w1b, b1, params["w2"], b2)

    return out[:b]


def init_params(key, state_size=2, hidden_size=64, output_size=3):
    """Deterministic init mimicking PyTorch nn.Linear default (U(-1/sqrt(in), 1/sqrt(in)))."""
    k1, k2, k3, k4 = jax.random.split(key, 4)
    in1 = state_size * 2
    bound1 = 1.0 / jnp.sqrt(in1)
    bound2 = 1.0 / jnp.sqrt(hidden_size)
    return {
        "w1": jax.random.uniform(k1, (in1, hidden_size), jnp.float32, -bound1, bound1),
        "b1": jax.random.uniform(k2, (hidden_size,), jnp.float32, -bound1, bound1),
        "w2": jax.random.uniform(k3, (hidden_size, output_size), jnp.float32, -bound2, bound2),
        "b2": jax.random.uniform(k4, (output_size,), jnp.float32, -bound2, bound2),
    }


def _reference(state, next_state, params):
    x = jnp.concatenate([state, next_state], axis=1)
    return jnp.maximum(x @ params["w1"] + params["b1"], 0.0) @ params["w2"] + params["b2"]


if __name__ == "__main__":
    key = jax.random.PRNGKey(0)
    kp, ks, kn, ks2, kn2 = jax.random.split(key, 5)

    state_size, hidden_size, output_size = 2, 64, 3
    params = init_params(kp, state_size, hidden_size, output_size)

    # --- small demo shape (batch=2), forcing the Pallas kernel path ---
    batch = 2
    state = jax.random.normal(ks, (batch, state_size), jnp.float32)
    next_state = jax.random.normal(kn, (batch, state_size), jnp.float32)

    rewards = reward_model_forward(state, next_state, params, force_kernel=True)
    rewards = jax.block_until_ready(rewards)

    ref = _reference(state, next_state, params)
    assert rewards.shape == (batch, output_size)
    assert jnp.allclose(rewards, ref, atol=1e-5), "mismatch vs reference (small batch)"

    # --- larger batch: exercises multi-step grid, ragged-tile padding, parallel axis ---
    big_batch = 2000  # not a multiple of the tile -> padded last tile
    state_b = jax.random.normal(ks2, (big_batch, state_size), jnp.float32)
    next_state_b = jax.random.normal(kn2, (big_batch, state_size), jnp.float32)

    rewards_b = reward_model_forward(
        state_b, next_state_b, params, block_rows=512, force_kernel=True
    )
    rewards_b = jax.block_until_ready(rewards_b)

    ref_b = _reference(state_b, next_state_b, params)
    assert rewards_b.shape == (big_batch, output_size)
    assert jnp.allclose(rewards_b, ref_b, atol=1e-5), "mismatch vs reference (big batch)"

    print("KERNEL_OK")
</pallas_src>

<mosaic_0001>
module attributes {stable_mosaic.version = 11 : i64} {
  func.func @reward_mlp_kernel(%arg0: i32, %arg1: memref<8x2xf32, #tpu.memory_space<vmem>>, %arg2: memref<8x2xf32, #tpu.memory_space<vmem>>, %arg3: memref<2x64xf32, #tpu.memory_space<vmem>>, %arg4: memref<2x64xf32, #tpu.memory_space<vmem>>, %arg5: memref<1x64xf32, #tpu.memory_space<vmem>>, %arg6: memref<64x3xf32, #tpu.memory_space<vmem>>, %arg7: memref<1x3xf32, #tpu.memory_space<vmem>>, %arg8: memref<8x3xf32, #tpu.memory_space<vmem>>) attributes {dimension_semantics = [#tpu.dimension_semantics<parallel>], iteration_bounds = array<i64: 1>, scalar_prefetch = 0 : i64, scratch_operands = 0 : i64, tpu.core_type = #tpu.core_type<tc>, window_params = [{transform_indices = @transform_0, window_bounds = array<i64: 8, 2>}, {transform_indices = @transform_1, window_bounds = array<i64: 8, 2>}, {pipeline_mode = #tpu.pipeline_mode<synchronous>, transform_indices = @transform_2, window_bounds = array<i64: 2, 64>}, {pipeline_mode = #tpu.pipeline_mode<synchronous>, transform_indices = @transform_3, window_bounds = array<i64: 2, 64>}, {pipeline_mode = #tpu.pipeline_mode<synchronous>, transform_indices = @transform_4, window_bounds = array<i64: 1, 64>}, {pipeline_mode = #tpu.pipeline_mode<synchronous>, transform_indices = @transform_5, window_bounds = array<i64: 64, 3>}, {pipeline_mode = #tpu.pipeline_mode<synchronous>, transform_indices = @transform_6, window_bounds = array<i64: 1, 3>}, {transform_indices = @transform_7, window_bounds = array<i64: 8, 3>}]} {
    %c0 = arith.constant 0 : index
    %c0_0 = arith.constant 0 : index
    %0 = vector.load %arg1[%c0, %c0_0] : memref<8x2xf32, #tpu.memory_space<vmem>>, vector<8x2xf32>
    %c0_1 = arith.constant 0 : index
    %c0_2 = arith.constant 0 : index
    %1 = vector.load %arg3[%c0_1, %c0_2] : memref<2x64xf32, #tpu.memory_space<vmem>>, vector<2x64xf32>
    %cst = arith.constant dense<0.000000e+00> : vector<8x64xf32>
    %2 = tpu.matmul %0, %1, %cst {dimension_numbers = #tpu.dot_dimension_numbers<[1], [0], [0], [1], [0, 0, 1, 1], [], []>} : vector<8x2xf32>, vector<2x64xf32>, vector<8x64xf32> -> vector<8x64xf32>
    %c0_3 = arith.constant 0 : index
    %c0_4 = arith.constant 0 : index
    %3 = vector.load %arg2[%c0_3, %c0_4] : memref<8x2xf32, #tpu.memory_space<vmem>>, vector<8x2xf32>
    %c0_5 = arith.constant 0 : index
    %c0_6 = arith.constant 0 : index
    %4 = vector.load %arg4[%c0_5, %c0_6] : memref<2x64xf32, #tpu.memory_space<vmem>>, vector<2x64xf32>
    %cst_7 = arith.constant dense<0.000000e+00> : vector<8x64xf32>
    %5 = tpu.matmul %3, %4, %cst_7 {dimension_numbers = #tpu.dot_dimension_numbers<[1], [0], [0], [1], [0, 0, 1, 1], [], []>} : vector<8x2xf32>, vector<2x64xf32>, vector<8x64xf32> -> vector<8x64xf32>
    %6 = arith.addf %2, %5 : vector<8x64xf32>
    %c0_8 = arith.constant 0 : index
    %c0_9 = arith.constant 0 : index
    %7 = vector.load %arg5[%c0_8, %c0_9] : memref<1x64xf32, #tpu.memory_space<vmem>>, vector<1x64xf32>
    %8 = vector.broadcast %7 : vector<1x64xf32> to vector<8x64xf32>
    %9 = arith.addf %6, %8 : vector<8x64xf32>
    %cst_10 = arith.constant 0.000000e+00 : f32
    %10 = vector.broadcast %cst_10 : f32 to vector<8x64xf32>
    %11 = arith.maximumf %9, %10 : vector<8x64xf32>
    %c0_11 = arith.constant 0 : index
    %c0_12 = arith.constant 0 : index
    %12 = vector.load %arg6[%c0_11, %c0_12] : memref<64x3xf32, #tpu.memory_space<vmem>>, vector<64x3xf32>
    %cst_13 = arith.constant dense<0.000000e+00> : vector<8x3xf32>
    %13 = tpu.matmul %11, %12, %cst_13 {dimension_numbers = #tpu.dot_dimension_numbers<[1], [0], [0], [1], [0, 0, 1, 1], [], []>} : vector<8x64xf32>, vector<64x3xf32>, vector<8x3xf32> -> vector<8x3xf32>
    %c0_14 = arith.constant 0 : index
    %c0_15 = arith.constant 0 : index
    %14 = vector.load %arg7[%c0_14, %c0_15] : memref<1x3xf32, #tpu.memory_space<vmem>>, vector<1x3xf32>
    %15 = vector.broadcast %14 : vector<1x3xf32> to vector<8x3xf32>
    %16 = arith.addf %13, %15 : vector<8x3xf32>
    %c0_16 = arith.constant 0 : index
    %c0_17 = arith.constant 0 : index
    %17 = vector.load %arg8[%c0_16, %c0_17] : memref<8x3xf32, #tpu.memory_space<vmem>>, vector<8x3xf32>
    tpu.vector_store %arg8[%c0_16, %c0_17], %16 {strides = array<i32>} : memref<8x3xf32, #tpu.memory_space<vmem>>, vector<8x3xf32>,
    return
  }
  func.func @transform_0(%arg0: i32) -> (i32, i32) {
    %c0_i32 = arith.constant 0 : i32
    %c0_i32_0 = arith.constant 0 : i32
    return %arg0, %c0_i32 : i32, i32
  }
  func.func @transform_1(%arg0: i32) -> (i32, i32) {
    %c0_i32 = arith.constant 0 : i32
    %c0_i32_0 = arith.constant 0 : i32
    return %arg0, %c0_i32 : i32, i32
  }
  func.func @transform_2(%arg0: i32) -> (i32, i32) {
    %c0_i32 = arith.constant 0 : i32
    %c0_i32_0 = arith.constant 0 : i32
    %c0_i32_1 = arith.constant 0 : i32
    return %c0_i32, %c0_i32_0 : i32, i32
  }
  func.func @transform_3(%arg0: i32) -> (i32, i32) {
    %c0_i32 = arith.constant 0 : i32
    %c0_i32_0 = arith.constant 0 : i32
    %c0_i32_1 = arith.constant 0 : i32
    return %c0_i32, %c0_i32_0 : i32, i32
  }
  func.func @transform_4(%arg0: i32) -> (i32, i32) {
    %c0_i32 = arith.constant 0 : i32
    %c0_i32_0 = arith.constant 0 : i32
    %c0_i32_1 = arith.constant 0 : i32
    return %c0_i32, %c0_i32_0 : i32, i32
  }
  func.func @transform_5(%arg0: i32) -> (i32, i32) {
    %c0_i32 = arith.constant 0 : i32
    %c0_i32_0 = arith.constant 0 : i32
    %c0_i32_1 = arith.constant 0 : i32
    return %c0_i32, %c0_i32_0 : i32, i32
  }
  func.func @transform_6(%arg0: i32) -> (i32, i32) {
    %c0_i32 = arith.constant 0 : i32
    %c0_i32_0 = arith.constant 0 : i32
    %c0_i32_1 = arith.constant 0 : i32
    return %c0_i32, %c0_i32_0 : i32, i32
  }
  func.func @transform_7(%arg0: i32) -> (i32, i32) {
    %c0_i32 = arith.constant 0 : i32
    %c0_i32_0 = arith.constant 0 : i32
    return %arg0, %c0_i32 : i32, i32
  }
}

</mosaic_0001>

<bundles_post_ra>
// kernel: tpu_custom_call.1
= control target key start
LH: loop header
LB: loop body
LE: loop exit
PB: predicated region body
PF: predicated region fallthrough
CT: control target
= control target key end

     0   :  { %vm34_vm0 = vcmask 1041408   ;;  %vm30_vm1 = vcmask 15360   ;;  %v352_v0 = vmov 0.0   ;;  %vm353_vm2 = vmmov 0   ;;  %s447_s3 = inlined_call_operand.vmem [shape: f32[2,64], index: 3, kind: input, shape index: {}]   ;;  %s448_s1 = inlined_call_operand.vmem [shape: f32[8,2], index: 1, kind: input, shape index: {}]   ;;  %s449_s2 = inlined_call_operand.vmem [shape: f32[2,64], index: 2, kind: input, shape index: {}]   ;;  %s450_s5 = inlined_call_operand.vmem [shape: f32[64,3], index: 5, kind: input, shape index: {}]   ;;  %s451_s0 = inlined_call_operand.vmem [shape: f32[8,2], index: 0, kind: input, shape index: {}]   ;;  %s452_s4 = inlined_call_operand.vmem [shape: f32[1,64], index: 4, kind: input, shape index: {}]   ;;  %s453_s6 = inlined_call_operand.vmem [shape: f32[1,3], index: 6, kind: input, shape index: {}]   ;;  %s454_s7 = inlined_call_operand.vmem [shape: f32[8,3], index: 7, kind: output, shape index: {}]  }
   0x1   :  { %308 = vmatprep.subr.mxu1 %v352_v0  ;;  %v29_v1 = vld [vmem:[%s447_s3] sm:$0x3]  ;;  %310 = vmatprep.mubr.msk.f32.mxu1 %vm353_vm2, %v352_v0  ;;  %v354_v4 = vmov 0.0|0.0   ;;  %v194_v6 = vld [vmem:[%s450_s5 + $0x8] sm:$0xff]  ;;  %v195_v9 = vld [vmem:[%s450_s5 + $0x10] sm:$0xff]  ;;  %vm208_vm3 = vcmask 523264  }
   0x2   :  { %v28_v2 = vld [vmem:[%s448_s1] sm:$0xff]  ;;  %309 = vmatpush3.msk.msra.mxu1 %vm34_vm0, %v29_v1  ;;  %337 = vmatprep.subr.bf16.mxu0 %v354_v4  ;;  %v196_v10 = vld [vmem:[%s450_s5 + $0x18] sm:$0xff]  ;;  %v198_v13 = vld [vmem:[%s450_s5 + $0x28] sm:$0xff]  ;;  %vm282_vm4 = vcmask 23552  }
   0x3   :  { %v27_v3 = vld [vmem:[%s449_s2] sm:$0x3]  ;;  %311 = vmatmul.mubr.msk.f32.vlgmr.msra.gmra.mrb[0].mxu1 %vm30_vm1, %v28_v2  ;;  %313 = vmatprep.subr.mxu1 %v352_v0  ;;  %v341_v11 = vpack.c.bf16 %v196_v10, %v195_v9  ;;  %v199_v15 = vld [vmem:[%s450_s5 + $0x30] sm:$0xff]  ;;  %v200_v16 = vld [vmem:[%s450_s5 + $0x38] sm:$0xff] }
   0x4   :  { %v193_v5 = vld [vmem:[%s450_s5] sm:$0xff]  ;;  %314 = vmatpush3.msk.msra.mxu1 %vm34_vm0, %v27_v3  ;;  %315 = vmatprep.mubr.msk.f32.mxu1 %vm353_vm2, %v352_v0  ;;  %v347_v17 = vpack.c.bf16 %v200_v16, %v199_v15 }
   0x5   :  { %v338_v7 = vpack.c.bf16 %v194_v6, %v193_v5  ;;  %v26_v8 = vld [vmem:[%s451_s0] sm:$0xff]  ;;  %334 = vmatprep.mubr.msk.f32.mxu0 %vm353_vm2, %v352_v0 }
   0x6   :  { %v197_v12 = vld [vmem:[%s450_s5 + $0x20] sm:$0xff] }
   0x7   :  { %339 = vmatpush3.bf16.msra.mxu0 %v338_v7  ;;  %316 = vmatmul.mubr.msk.f32.vlgmr.msra.gmra.mrb[2].mxu1 %vm30_vm1, %v26_v8  ;;  %v344_v14 = vpack.c.bf16 %v198_v13, %v197_v12  ;;  %v292_v21 = vld [vmem:[%s452_s4] ss:$0 sm:$0xff] }
   0x8   :  { %340 = vmatprep.subr.bf16.mxu0 %v354_v4  ;;  %v293_v26 = vld [vmem:[%s453_s6] ss:$0 sm:$0xff] }
   0xb   :  { %342 = vmatpush3.bf16.msra.mxu0 %v341_v11 }
   0xc   :  { %343 = vmatprep.subr.bf16.mxu0 %v354_v4 }
   0xf   :  { %345 = vmatpush3.bf16.msra.mxu0 %v344_v14 }
  0x10   :  { %346 = vmatprep.subr.bf16.mxu0 %v354_v4 }
  0x13   :  { %348 = vmatpush3.bf16.msra.mxu0 %v347_v17 }
  0xd6   :  { %v104_v18 = vpop.f32.mrb[0].mxu1 }
  0xd7   :  { %v312_v19 = vpop.f32.mrb[1].mxu1 }
  0xda   :  { %v180_v20 = vpop.f32.mrb[2].mxu1 }
  0xdb   :  { %v181_v22 = vadd.f32 %v180_v20, %v104_v18  ;;  %v317_v23 = vpop.f32.mrb[3].mxu1 }
  0xdd   :  { %v191_v24 = vadd.f32 %v292_v21, %v181_v22 }
  0xdf   :  { %v192_v25 = vmax.f32 %v191_v24, 0.0 }
  0xe1   :  { %335 = vmatmul.mubr.msk.f32.vlgmr.msra.gmra.mrb[0].mxu0 %vm208_vm3, %v192_v25 }
 0x1b4   :  { %v278_v27 = vpop.f32.mrb[0].mxu0 }
 0x1b5   :  { %v279_v28 = vadd.f32 %v293_v26, %v278_v27  ;;  %v336_v29 = vpop.f32.mrb[1].mxu0 }
 0x1b7   :  { %283 = vst.msk [vmem:[%s454_s7] sm:$0xff] %vm282_vm4, %v279_v28 }

</bundles_post_ra>
